<compile_context>
chip_gen: v7x
topology: tpu7x:2x2x1
jax: 0.10.0
libtpu: 0.0.40
codegen_flags: <defaults>
</compile_context>

<pallas_src>
import numpy as np
import jax
import jax.numpy as jnp
from jax.experimental import pallas as pl
from jax.experimental.pallas import tpu as pltpu


# ---------------------------------------------------------------------------
# DCT helpers (numpy, init-time only; match torch_dct with norm=None)
# ---------------------------------------------------------------------------
def _dct2_matrix(n: int) -> np.ndarray:
    # torch_dct DCT-II, norm=None:  X[k] = 2 * sum_m x[m] cos(pi*(2m+1)*k/(2N))
    k = np.arange(n, dtype=np.float64)[:, None]
    m = np.arange(n, dtype=np.float64)[None, :]
    return 2.0 * np.cos(np.pi * (2.0 * m + 1.0) * k / (2.0 * n))


def _idct_matrix(n: int) -> np.ndarray:
    # exact inverse of the above (DCT-III):
    #   x[m] = (1/N) * [ X[0]/2 + sum_{k>=1} X[k] cos(pi*(2m+1)*k/(2N)) ]
    m = np.arange(n, dtype=np.float64)[:, None]
    k = np.arange(n, dtype=np.float64)[None, :]
    B = np.cos(np.pi * (2.0 * m + 1.0) * k / (2.0 * n)) / n
    B[:, 0] *= 0.5
    return B


def initialize_spectral_indices(weight: np.ndarray, n_frequency: int,
                                in_features: int, energy_threshold: float = 0.95):
    # Faithful numpy port of FourierLayer.initialize_spectral_indices (init-time glue).
    D_out = _dct2_matrix(weight.shape[0])
    D_in = _dct2_matrix(weight.shape[1])
    weight_dct = D_out @ weight.astype(np.float64) @ D_in.T          # dct.dct_2d(W)
    flattened = np.abs(weight_dct).ravel()
    sorted_indices = np.argsort(-flattened, kind="stable")           # descending
    cumulative = np.cumsum(flattened[sorted_indices])
    total = cumulative[-1]
    selected = sorted_indices[cumulative / total <= energy_threshold]
    if len(selected) < n_frequency:
        selected = sorted_indices[:n_frequency]
    high_freq = sorted_indices[-(n_frequency // 5):]
    sel = np.concatenate([selected, high_freq])
    sel = np.unique(sel)[:n_frequency]
    return np.stack([sel // in_features, sel % in_features], axis=0).astype(np.int32)


# ---------------------------------------------------------------------------
# Adapter delta (tiny one-shot op -> plain XLA at adapter-update time)
# ---------------------------------------------------------------------------
def compute_delta_w(spectrum: jax.Array, indices: np.ndarray, in_features: int,
                    scale: float) -> jax.Array:
    idct = jnp.asarray(_idct_matrix(in_features), jnp.float32)
    dense_s = jnp.zeros((in_features, in_features), jnp.float32).at[
        jnp.asarray(indices[0]), jnp.asarray(indices[1])].set(
            spectrum.astype(jnp.float32))
    return (idct @ dense_s @ idct.T) * jnp.float32(scale)


# ---------------------------------------------------------------------------
# One-time weight preparation (hoisted off the hot path)
# ---------------------------------------------------------------------------
def _round_up(v: int, m: int) -> int:
    return (v + m - 1) // m * m


def _select_tiles(K: int, N: int, expected_rows):
    """Generation-aware tile sizes + scoped-VMEM limit."""
    try:
        vmem_bytes = int(pltpu.get_tpu_info().vmem_capacity_bytes)
    except Exception:
        vmem_bytes = 64 << 20                       # conservative (v7x-sized) fallback
    big_vmem = vmem_bytes >= (100 << 20)            # v5e/v6e: 128 MiB, v7x: 64 MiB
    tm = 512
    tn = 1024 if big_vmem else 512                  # v6e: widest MXU/HBM gap -> biggest tiles
    tk = 512                                        # multiple of 256: full-width MXU passes
    vmem_limit = min(96 << 20, (3 * vmem_bytes) // 4)   # ~96 MiB on 128-MiB chips, ~48 on v7x

    tn = min(tn, _round_up(N, 128))
    tk = min(tk, _round_up(K, 128))
    if expected_rows is not None:
        tm = min(tm, _round_up(expected_rows, 128))
        m_blocks = _round_up(expected_rows, tm) // tm
        n_blocks = _round_up(N, tn) // tn
        # v7x has 2 TensorCores sharded over "parallel" grid axes: keep >= 2 blocks
        if m_blocks == 1 and n_blocks == 1 and tn >= 256:
            tn = max(128, ((tn // 2) // 128) * 128)
    return tm, tn, tk, vmem_limit


def prepare_fourier_linear(weight: jax.Array, bias: jax.Array, spectrum: jax.Array,
                           indices: np.ndarray, scale: float, *,
                           compute_dtype=jnp.bfloat16, out_dtype=None,
                           expected_rows=None, tm=None, tn=None, tk=None):
    """Fold the Fourier adapter into the base weight ONCE (adapter-update time):
         w_eff = W^T + scale * idct2(dense_spectrum)        (f32 fold)
       then a single cast to compute_dtype and an edge-only zero-pad to tile
       multiples.  Cached for all subsequent forward calls (no per-call weight
       transpose / add / cast / pad traffic)."""
    fout, fin = weight.shape
    # the original module's `result += x @ delta_w` only broadcasts when fout == fin
    assert fout == fin, "fourier adapter requires out_features == in_features"
    K, N = fin, fout

    delta_w = compute_delta_w(spectrum, indices, fin, scale)            # (K, N) f32
    w_eff = weight.T.astype(jnp.float32) + delta_w                      # exact f32 fold

    a_tm, a_tn, a_tk, vmem_limit = _select_tiles(K, N, expected_rows)
    tm = a_tm if tm is None else tm
    tn = a_tn if tn is None else tn
    tk = a_tk if tk is None else tk

    Kp, Np = _round_up(K, tk), _round_up(N, tn)
    if (Kp, Np) == (K, N):
        w_p = w_eff.astype(compute_dtype)                # no pad needed
    else:
        w_p = jnp.zeros((Kp, Np), compute_dtype).at[:K, :N].set(
            w_eff.astype(compute_dtype))                 # cast fused into the pad
    if Np == N:
        b_p = bias.astype(jnp.float32).reshape(1, N)
    else:
        b_p = jnp.zeros((1, Np), jnp.float32).at[0, :N].set(bias.astype(jnp.float32))

    return dict(w_p=w_p, b_p=b_p, K=K, N=N, tm=tm, tn=tn, tk=tk,
                compute_dtype=compute_dtype, out_dtype=out_dtype,
                vmem_limit=vmem_limit)


# ---------------------------------------------------------------------------
# Pallas kernel: tiled  out = x @ w_eff + bias  with f32 accumulator scratch
# ---------------------------------------------------------------------------
def fused_linear_kernel(x_ref, w_ref, b_ref, o_ref, acc_ref):
    k = pl.program_id(2)
    contrib = jnp.dot(x_ref[...], w_ref[...], preferred_element_type=jnp.float32)

    @pl.when(k == 0)
    def _():
        acc_ref[...] = contrib          # first K-step: write, no zero-init pass

    @pl.when(k > 0)
    def _():
        acc_ref[...] += contrib

    @pl.when(k == pl.num_programs(2) - 1)
    def _():
        # bias added exactly once, in the finalize step
        o_ref[...] = (acc_ref[...] + b_ref[...]).astype(o_ref.dtype)


def fourier_linear(x: jax.Array, params: dict, *, use_pallas=None) -> jax.Array:
    """result = x @ (W^T + scale*idct2(spectrum)) + bias  (fold cached in params)."""
    b, s, K = x.shape
    assert K == params["K"]
    N = params["N"]
    M = b * s
    compute_dtype = params["compute_dtype"]
    out_dtype = params["out_dtype"] if params["out_dtype"] is not None else x.dtype

    if use_pallas is None:
        # tiny problems: padding + launch overhead dominate -> plain XLA wins
        use_pallas = (M >= 128 and max(K, N) >= 256)
    if not use_pallas:
        w = params["w_p"][:K, :N]
        out = jnp.dot(x.reshape(M, K).astype(compute_dtype), w,
                      preferred_element_type=jnp.float32) + params["b_p"][0, :N]
        return out.astype(out_dtype).reshape(b, s, N)

    tm = min(params["tm"], _round_up(M, 128))
    tn, tk = params["tn"], params["tk"]
    Kp, Np = params["w_p"].shape
    Mp = _round_up(M, tm)

    x2d = x.reshape(M, K)
    if (Mp, Kp) == (M, K):
        x_p = x2d.astype(compute_dtype)                  # no pad copy in the common case
    else:
        x_p = jnp.zeros((Mp, Kp), compute_dtype).at[:M, :K].set(
            x2d.astype(compute_dtype))

    grid = (Mp // tm, Np // tn, Kp // tk)
    out_p = pl.pallas_call(
        fused_linear_kernel,
        out_shape=jax.ShapeDtypeStruct((Mp, Np), out_dtype),
        grid_spec=pltpu.PrefetchScalarGridSpec(
            num_scalar_prefetch=0,
            grid=grid,
            in_specs=[
                pl.BlockSpec((tm, tk), lambda i, j, k: (i, k)),   # x tile
                pl.BlockSpec((tk, tn), lambda i, j, k: (k, j)),   # w_eff tile
                pl.BlockSpec((1, tn), lambda i, j, k: (0, j)),    # bias tile
            ],
            out_specs=pl.BlockSpec((tm, tn), lambda i, j, k: (i, j)),
            scratch_shapes=[pltpu.VMEM((tm, tn), jnp.float32)],
        ),
        compiler_params=pltpu.CompilerParams(
            dimension_semantics=("parallel", "parallel", "arbitrary"),
            vmem_limit_bytes=params["vmem_limit"]),
    )(x_p, params["w_p"], params["b_p"])

    out = out_p if (Mp, Np) == (M, N) else out_p[:M, :N]
    return out.reshape(b, s, N)


# ---------------------------------------------------------------------------
# Driver
# ---------------------------------------------------------------------------
if __name__ == "__main__":
    # Module requires out_features == in_features for the `result +=` to broadcast.
    in_features = out_features = 256
    batch, seq = 2, 64                # M = 128 rows; all dims lane-aligned (no padding)
    n_frequency = 64
    scale = 10.0                      # keep the adapter's effect well above bf16 noise

    key = jax.random.PRNGKey(0)
    kw, kb, ks, kx = jax.random.split(key, 4)
    # deterministic synthetic init of the base nn.Linear and the adapter spectrum
    weight = jax.random.normal(kw, (out_features, in_features), jnp.float32) * 0.05
    bias = jax.random.normal(kb, (out_features,), jnp.float32) * 0.01
    spectrum = jax.random.normal(ks, (n_frequency,), jnp.float32)
    x = jax.random.normal(kx, (batch, seq, in_features), jnp.float32)

    # init-time index selection (glue, matches FourierLayer.update_layer)
    indices = initialize_spectral_indices(np.asarray(weight), n_frequency, in_features)
    assert indices.shape[1] == n_frequency

    # one-time fold / cast / pad (adapter-update time, off the hot path)
    params = prepare_fourier_linear(weight, bias, spectrum, indices, scale,
                                    expected_rows=batch * seq)

    # hot path: single cached-weight matmul in Pallas (force the Pallas path so
    # the kernel is exercised even at this small demo size)
    out = fourier_linear(x, params, use_pallas=True)
    out = jax.block_until_ready(out)

    # pure-JAX f32 reference check (bf16 MXU inputs -> loosened tolerance)
    dw_ref = compute_delta_w(spectrum, indices, in_features, scale)
    ref = x @ weight.T + bias + jnp.einsum("ijk,kl->ijl", x, dw_ref)
    np.testing.assert_allclose(np.asarray(out), np.asarray(ref), rtol=2e-2, atol=2e-2)
    print("KERNEL_OK")
</pallas_src>

<mosaic_0001>
module attributes {stable_mosaic.version = 11 : i64} {
  func.func @fused_linear_kernel(%arg0: i32, %arg1: i32, %arg2: i32, %arg3: memref<128x256xbf16, #tpu.memory_space<vmem>>, %arg4: memref<256x128xbf16, #tpu.memory_space<vmem>>, %arg5: memref<1x128xf32, #tpu.memory_space<vmem>>, %arg6: memref<128x128xf32, #tpu.memory_space<vmem>>, %arg7: memref<128x128xf32, #tpu.memory_space<vmem>>) attributes {dimension_semantics = [#tpu.dimension_semantics<parallel>, #tpu.dimension_semantics<parallel>, #tpu.dimension_semantics<arbitrary>], iteration_bounds = array<i64: 1, 2, 1>, scalar_prefetch = 0 : i64, scratch_operands = 1 : i64, tpu.core_type = #tpu.core_type<tc>, window_params = [{transform_indices = @transform_0, window_bounds = array<i64: 128, 256>}, {transform_indices = @transform_1, window_bounds = array<i64: 256, 128>}, {transform_indices = @transform_2, window_bounds = array<i64: 1, 128>}, {transform_indices = @transform_3, window_bounds = array<i64: 128, 128>}]} {
    %c0 = arith.constant 0 : index
    %c0_0 = arith.constant 0 : index
    %0 = vector.load %arg3[%c0, %c0_0] : memref<128x256xbf16, #tpu.memory_space<vmem>>, vector<128x256xbf16>
    %c0_1 = arith.constant 0 : index
    %c0_2 = arith.constant 0 : index
    %1 = vector.load %arg4[%c0_1, %c0_2] : memref<256x128xbf16, #tpu.memory_space<vmem>>, vector<256x128xbf16>
    %cst = arith.constant dense<0.000000e+00> : vector<128x128xf32>
    %2 = tpu.matmul %0, %1, %cst {dimension_numbers = #tpu.dot_dimension_numbers<[1], [0], [0], [1], [0, 0, 1, 1], [], []>} : vector<128x256xbf16>, vector<256x128xbf16>, vector<128x128xf32> -> vector<128x128xf32>
    %c0_i32 = arith.constant 0 : i32
    %3 = arith.cmpi eq, %arg2, %c0_i32 : i32
    %4 = arith.extui %3 : i1 to i32
    %c0_i32_3 = arith.constant 0 : i32
    %5 = arith.cmpi ne, %4, %c0_i32_3 : i32
    scf.if %5 {
      %c0_8 = arith.constant 0 : index
      %c0_9 = arith.constant 0 : index
      %12 = vector.load %arg7[%c0_8, %c0_9] : memref<128x128xf32, #tpu.memory_space<vmem>>, vector<128x128xf32>
      tpu.vector_store %arg7[%c0_8, %c0_9], %2 {strides = array<i32>} : memref<128x128xf32, #tpu.memory_space<vmem>>, vector<128x128xf32>,
    } else {
    }
    %c0_i32_4 = arith.constant 0 : i32
    %6 = arith.cmpi sgt, %arg2, %c0_i32_4 : i32
    %7 = arith.extui %6 : i1 to i32
    %c0_i32_5 = arith.constant 0 : i32
    %8 = arith.cmpi ne, %7, %c0_i32_5 : i32
    scf.if %8 {
      %c0_8 = arith.constant 0 : index
      %c0_9 = arith.constant 0 : index
      %12 = vector.load %arg7[%c0_8, %c0_9] : memref<128x128xf32, #tpu.memory_space<vmem>>, vector<128x128xf32>
      %13 = arith.addf %12, %2 : vector<128x128xf32>
      %c0_10 = arith.constant 0 : index
      %c0_11 = arith.constant 0 : index
      %14 = vector.load %arg7[%c0_10, %c0_11] : memref<128x128xf32, #tpu.memory_space<vmem>>, vector<128x128xf32>
      tpu.vector_store %arg7[%c0_10, %c0_11], %13 {strides = array<i32>} : memref<128x128xf32, #tpu.memory_space<vmem>>, vector<128x128xf32>,
    } else {
    }
    %c0_i32_6 = arith.constant 0 : i32
    %9 = arith.cmpi eq, %arg2, %c0_i32_6 : i32
    %10 = arith.extui %9 : i1 to i32
    %c0_i32_7 = arith.constant 0 : i32
    %11 = arith.cmpi ne, %10, %c0_i32_7 : i32
    scf.if %11 {
      %c0_8 = arith.constant 0 : index
      %c0_9 = arith.constant 0 : index
      %12 = vector.load %arg7[%c0_8, %c0_9] : memref<128x128xf32, #tpu.memory_space<vmem>>, vector<128x128xf32>
      %c0_10 = arith.constant 0 : index
      %c0_11 = arith.constant 0 : index
      %13 = vector.load %arg5[%c0_10, %c0_11] : memref<1x128xf32, #tpu.memory_space<vmem>>, vector<1x128xf32>
      %14 = vector.broadcast %13 : vector<1x128xf32> to vector<128x128xf32>
      %15 = arith.addf %12, %14 : vector<128x128xf32>
      %c0_12 = arith.constant 0 : index
      %c0_13 = arith.constant 0 : index
      %16 = vector.load %arg6[%c0_12, %c0_13] : memref<128x128xf32, #tpu.memory_space<vmem>>, vector<128x128xf32>
      tpu.vector_store %arg6[%c0_12, %c0_13], %15 {strides = array<i32>} : memref<128x128xf32, #tpu.memory_space<vmem>>, vector<128x128xf32>,
    } else {
    }
    return
  }
  func.func @transform_0(%arg0: i32, %arg1: i32, %arg2: i32) -> (i32, i32) {
    %c0_i32 = arith.constant 0 : i32
    return %arg0, %arg2 : i32, i32
  }
  func.func @transform_1(%arg0: i32, %arg1: i32, %arg2: i32) -> (i32, i32) {
    %c0_i32 = arith.constant 0 : i32
    return %arg2, %arg1 : i32, i32
  }
  func.func @transform_2(%arg0: i32, %arg1: i32, %arg2: i32) -> (i32, i32) {
    %c0_i32 = arith.constant 0 : i32
    %c0_i32_0 = arith.constant 0 : i32
    return %c0_i32, %arg1 : i32, i32
  }
  func.func @transform_3(%arg0: i32, %arg1: i32, %arg2: i32) -> (i32, i32) {
    %c0_i32 = arith.constant 0 : i32
    return %arg0, %arg1 : i32, i32
  }
}

</mosaic_0001>

<bundles_post_ra>
// kernel: tpu_custom_call.1
= control target key start
LH: loop header
LB: loop body
LE: loop exit
PB: predicated region body
PF: predicated region fallthrough
CT: control target
= control target key end

     0   :  { %8 = vsyncpa [#allocation4], 0  ;;  %s1553_s0 = inlined_call_operand.hbm [shape: bf16[128,256], index: 0, kind: input, shape index: {}]   ;;  %s1554_s1 = inlined_call_operand.hbm [shape: bf16[256,256], index: 1, kind: input, shape index: {}]   ;;  %s1555_s2 = inlined_call_operand.vmem [shape: f32[1,256], index: 2, kind: input, shape index: {}]   ;;  %s1556_s3 = inlined_call_operand.hbm [shape: f32[128,256], index: 3, kind: output, shape index: {}]  }
   0x1   :  { %9 = vsyncpa [#allocation7], 0 }
   0x2   :  { %11 = vsyncpa [#allocation7 + $0x1], 0 }
   0x3   :  { %12 = vsyncpa [#allocation5], 0 }
   0x4   :  { %14 = vsyncpa [#allocation5 + $0x1], 0  ;;  %s1266_s12 = smov 0   ;;  %s1268_s13 = smov 0  }
   0x5   :  { %s1270_s14 = smov 0   ;;  %s1272_s15 = smov 0  }
   0x6   :  { %s1274_s16 = smov 0   ;;  %s1276_s17 = smov 0  }
   0x7 LB: > { %s842_s18 = sadd.s32 4294967295, %s1234_s17   ;;  %s843_s19 = sadd.s32 4294967294, %s1234_s17   ;;  %s1234_s17 = sphi %s1276_s17, %s20_s17   ;;  %s1230_s16 = sphi %s1274_s16, %s1582_s16   ;;  %s1226_s15 = sphi %s1272_s15, %s1581_s15   ;;  %s1222_s14 = sphi %s1270_s14, %s1580_s14   ;;  %s1218_s13 = sphi %s1268_s13, %s1579_s13   ;;  %s1214_s12 = sphi %s1266_s12, %s1578_s12  }
   0x8   : > { %p83_p0 = scmp.ne.s32.totalorder %s1222_s14, %s1218_s13  ;;  %p84_p1 = scmp.eq.s32.totalorder %s1234_s17, 0 }
   0x9   : > { %p89_p2 = scmp.ne.s32.totalorder %s1218_s13, %s1214_s12  ;;  %p1303_p3 = scmp.eq.s32.totalorder %s842_s18, 0 }
   0xa   : > { %p1307_p4 = por %p84_p1, %p83_p0  ;;  %p141_p5 = scmp.eq.s32.totalorder %s842_s18, 1 }
   0xb   : > { %s1563_s20 = scalar_select %p1303_p3, 1, 0 }
   0xc   : > { %p1313_p6 = por %p1303_p3, %p89_p2  ;;  %p147_p7 = scmp.eq.s32.totalorder %s843_s19, 1 }
   0xd   : > { %p1317_p8 = por %p141_p5, %p83_p0  ;;  %p844_p9 = scmp.ge.s32.totalorder %s1234_s17, 1 }
   0xe   : > { %s1565_s22 = scalar_select %p1313_p6, 1, 0 }
   0xf   : > { %s1566_s23 = scalar_select %p1317_p8, 1, 0 }
  0x10   : > { %p1322_p10 = por %p147_p7, %p89_p2  ;;  %p154_p11 = scmp.lt.s32.totalorder %s1234_s17, 3 }
  0x11   : > { %s1236_s26 = smov [#allocation3]   ;;  %p991_p1 = scmp.lt.s32.totalorder %s1234_s17, 2 }
  0x12   : > { %s1567_s24 = scalar_select %p1322_p10, 1, 0 }
  0x13   : > { %p1327_p12 = pnand %p844_p9, %p154_p11  ;;  %s172_s27 = sshll.u32 %s1236_s26, 4  ;;  %s1331_s27 = int_to_ptr.vmem [resolvable:$true] %s172_s27 }
  0x14   : > { %p1345_p2 = pnand %p991_p1, %p1307_p4  ;;  %s35_s30 = sadd.s32 1, %s1230_s16 }
  0x15   : > { %s1568_s25 = scalar_select %p1327_p12, 1, 0 }
  0x16   : > { %p978_p13 = pneg %p1327_p12  ;;  %s1090_s6 = scalar_lea.hbm %s1553_s0, 2048 }
  0x17   : > { %s1570_s29 = scalar_select %p1345_p2, 1, 0 }
  0x18   : > { %p1339_p5 = pnand %p978_p13, %p1303_p3  ;;  %p1091_p7 = scmp.ne.s32.totalorder %s1553_s0, %s1090_s6 }
  0x19   : > { %p1097_p4 = scmp.lt.u32.totalorder %s1090_s6, %s1553_s0 }
  0x1a   : > { %p1092_p9 = pneg %p1339_p5 }
  0x1c   : > { %p1093_p11 = pnand %p1092_p9, %p1091_p7 }
  0x1e   : > { %p1094_p13 = pneg %p1093_p11 }
  0x20   : > { %p1099_p1 = pnand %p1097_p4, %p1094_p13 }
  0x22   : > { %1102 = shalt.err (!%p1099_p1)
}
  0x23   : > { %s1103_s11 = scalar_lea.vmem %s1331_s27, 2048  ;;  %p1111_p6 = scmp.lt.s32.totalorder %s1331_s27, %s1331_s27 }
  0x24   : > { %p1104_p0 = scmp.ne.s32.totalorder %s1331_s27, %s1103_s11  ;;  %p1112_p3 = scmp.lt.s32.totalorder %s1103_s11, %s1103_s11 }
  0x26   : > { %p1106_p10 = pnand %p1104_p0, %p1092_p9  ;;  %p1113_p12 = por %p1112_p3, %p1111_p6 }
  0x28   : > { %p1107_p8 = pneg %p1106_p10 }
  0x2a   : > { %p1114_p2 = pnand %p1113_p12, %p1107_p8 }
  0x2c   : > { %1117 = shalt.err (!%p1114_p2)
}
  0x2d   : > { %s1237_s18 = smov 128   ;;  %s1238_s19 = smov 8  }
  0x2e   : > { %981 = dma.hbm_to_vmem [thread:$0]  (!%p1339_p5), %s1553_s0, 2048, %s1331_s27, [#allocation4], %s1237_s18, %s1237_s18, %s1238_s19  }
  0x2f   : > { %p37_p10 = scmp.ge.s32.totalorder %s35_s30, 2  ;;  %s76_s4 = sadd.s32 1, %s1222_s14 }
  0x30   : > { %s186_s5 = sand.u32 1, %s1222_s14   ;;  %s848_s8 = sshll.u32 %s1230_s16, 6 }
  0x31   : > { %s1584_s30 = smov (%p37_p10, %s35_s30), 0  ;;  %s847_s6 = sshll.u32 %s186_s5, 7 }
  0x32   : > { %s72_s7 = ssub.s32 %s1230_s16, %s1584_s30  ;;  %s1383_s10 = scalar_lea.hbm %s1554_s1, %s848_s8 }
  0x33   : > { %p74_p3 = scmp.eq.s32.totalorder %s72_s7, 0  ;;  %s190_s27 = scalar_lea.vmem [#allocation6], %s847_s6 }
  0x34   : > { %s199_s11 = sshll.u32 %s190_s27, 4  ;;  %s1390_s21 = scalar_lea.sflag [#allocation7], %s186_s5  ;;  %s1388_s11 = int_to_ptr.vmem [resolvable:$true] %s199_s11 }
  0x35   : > { %s1386_s19 = scalar_select %p74_p3, %s1222_s14, %s76_s4  }
  0x36   : > { %s1118_s26 = scalar_lea.hbm %s1383_s10, 2048  ;;  %p1571_p8 = scmp.ne.s32.totalorder %s1570_s29, 0 }
  0x37   : > { %p1119_p6 = scmp.ne.s32.totalorder %s1383_s10, %s1118_s26  ;;  %s1123_s9 = scalar_lea.hbm %s1554_s1, 4096 }
  0x38   : > { %p1120_p12 = pneg %p1571_p8  ;;  %p1124_p2 = scmp.lt.u32.totalorder %s1383_s10, %s1554_s1 }
  0x39   : > { %p1125_p7 = scmp.lt.u32.totalorder %s1123_s9, %s1118_s26  ;;  %p1127_p11 = scmp.lt.u32.totalorder %s1118_s26, %s1383_s10 }
  0x3a   : > { %p1121_p0 = pnand %p1120_p12, %p1119_p6 }
  0x3b   : > { %p1126_p9 = por %p1125_p7, %p1124_p2 }
  0x3c   : > { %p1122_p5 = pneg %p1121_p0 }
  0x3d   : > { %p1128_p13 = por %p1127_p11, %p1126_p9 }
  0x3f   : > { %p1129_p4 = pnand %p1128_p13, %p1122_p5 }
  0x41   : > { %1132 = shalt.err (!%p1129_p4)
}
  0x42   : > { %s1133_s4 = scalar_lea.vmem %s1388_s11, 2048  ;;  %s1239_s5 = smov [#allocation6]  }
  0x43   : > { %p1134_p1 = scmp.ne.s32.totalorder %s1388_s11, %s1133_s4  ;;  %s1138_s27 = sshll.u32 %s1239_s5, 4  ;;  %s1139_s27 = int_to_ptr.vmem [resolvable:$false] %s1138_s27 }
  0x44   : > { %s1140_s7 = scalar_lea.vmem %s1139_s27, 4096  ;;  %p1141_p6 = scmp.lt.s32.totalorder %s1388_s11, %s1139_s27 }
  0x45   : > { %p1136_p10 = pnand %p1134_p1, %p1120_p12  ;;  %p1142_p0 = scmp.lt.s32.totalorder %s1140_s7, %s1133_s4 }
  0x47   : > { %p1137_p3 = pneg %p1136_p10  ;;  %p1143_p2 = por %p1142_p0, %p1141_p6 }
  0x49   : > { %p1144_p7 = pnand %p1143_p2, %p1137_p3 }
  0x4b   : > { %1147 = shalt.err (!%p1144_p7)
}
  0x4c   : > { %s1240_s26 = smov 64   ;;  %s1241_s8 = smov 4  }
  0x4d   : > { %985 = dma.hbm_to_vmem [thread:$0]  (!%p1571_p8), %s1383_s10, 2048, %s1388_s11, %s1390_s21, %s1237_s18, %s1240_s26, %s1241_s8  }
  0x4e   : > { %p1572_p12 = scmp.ne.s32.totalorder %s1568_s25, 0 }
  0x4f   : > { %p1573_p5 = scmp.ne.s32.totalorder (!%p1572_p12), %s1563_s20, 0 }
  0x50   : > { %217 = sbr.rel (%p1572_p12) target bundleno = 384 (0x180), region = 32 }
  0x57   : > { %1201 = dma.done.wait (%p1573_p5), [#allocation4], 2048  }
  0x58   : > { %1203 = vsyncadd (%p1573_p5), [#allocation4], 4294965248  ;;  %s1426_s9 = sand.u32 1, %s1218_s13   ;;  %p1574_p8 = scmp.ne.s32.totalorder %s1565_s22, 0 }
  0x59   : > { %s851_s6 = sshll.u32 %s1426_s9, 7  ;;  %s224_s29 = scalar_lea.sflag [#allocation7], %s1426_s9 }
  0x5a   : > { %s1432_s18 = scalar_lea.vmem [#allocation6], %s851_s6 }
  0x5b   : > { %1205 = dma.done.wait (%p1574_p8), %s224_s29, 2048  }
  0x5c   : > { %1207 = vsyncadd (%p1574_p8), %s224_s29, 4294965248  ;;  %v1050_v0 = vld [vmem:[%s1432_s18 + $0x40] sm:$0xff]   ;;  %v1052_v2 = vld [vmem:[%s1432_s18 + $0x48] sm:$0xff]   ;;  %p256_p9 = scmp.lt.s32.totalorder %s1226_s15, 1  ;;  %s1465_s11 = scalar_lea.vmem [#allocation8], %s851_s6 }
  0x5d   : > { %v1051_v1 = vld [vmem:[%s1432_s18] sm:$0xff]   ;;  %890 = vmatprep.subr.bf16.mxu0 %v1050_v0  ;;  %954 = vmatprep.subr.bf16.mxu1 %v1050_v0  ;;  %v1053_v3 = vld [vmem:[%s1432_s18 + $0x8] sm:$0xff]   ;;  %v1054_v4 = vld [vmem:[%s1432_s18 + $0x50] sm:$0xff]   ;;  %s887_s21 = sshll.u32 %s1226_s15, 7  ;;  %s728_s28 = sshll.u32 %s1465_s11, 4  ;;  %s1498_s28 = int_to_ptr.vmem [resolvable:$true] %s728_s28 }
  0x5e   : > { %891 = vmatpush3.bf16.msra.mxu0 %v1051_v1  ;;  %962 = vmatpush3.bf16.msra.mxu1 %v1051_v1  ;;  %v1055_v5 = vld [vmem:[%s1432_s18 + $0x10] sm:$0xff]   ;;  %v1056_v6 = vld [vmem:[%s1432_s18 + $0x58] sm:$0xff]   ;;  %v1058_v8 = vld [vmem:[%s1432_s18 + $0x60] sm:$0xff]   ;;  %s257_s20 = scalar_select %p256_p9, %s1226_s15, 1 }
  0x5f   : > { %892 = vmatprep.subr.bf16.mxu0 %v1052_v2  ;;  %955 = vmatprep.subr.bf16.mxu1 %v1052_v2  ;;  %v1057_v7 = vld [vmem:[%s1432_s18 + $0x18] sm:$0xff]   ;;  %v1059_v9 = vld [vmem:[%s1432_s18 + $0x20] sm:$0xff]   ;;  %v1060_v10 = vld [vmem:[%s1432_s18 + $0x68] sm:$0xff]   ;;  %s1496_s15 = scalar_lea.hbm %s1556_s3, %s887_s21  ;;  %s713_s27 = scalar_lea.sflag [#allocation5], %s1426_s9 }
  0x60   : > { %v1068_v11 = vld [vmem:[#allocation3 + $0x4] ss:$8 sps:$4 sm:$0xff]   ;;  %v1062_v14 = vld [vmem:[%s1432_s18 + $0x70] sm:$0xff]   ;;  %v1064_v16 = vld [vmem:[%s1432_s18 + $0x78] sm:$0xff]   ;;  %s258_s10 = scalar_lea.vmem %s1555_s2, %s257_s20  ;;  %s1148_s7 = scalar_lea.vmem %s1498_s28, 2048 }
  0x61   : > { %v1071_v12 = vld [vmem:[#allocation3 + $0x44] ss:$8 sps:$4 sm:$0xff]   ;;  %517 = vmatprep.mubr.bf16.mxu0 %v1068_v11  ;;  %v1063_v15 = vld [vmem:[%s1432_s18 + $0x30] sm:$0xff]   ;;  %v1065_v17 = vld [vmem:[%s1432_s18 + $0x38] sm:$0xff]   ;;  %p1149_p11 = scmp.ne.s32.totalorder %s1498_s28, %s1148_s7  ;;  %p1575_p13 = scmp.ne.s32.totalorder %s1566_s23, 0 }
  0x62   : > { %893 = vmatpush3.bf16.msra.mxu0 %v1053_v3  ;;  %963 = vmatpush3.bf16.msra.mxu1 %v1053_v3  ;;  %v1061_v13 = vld [vmem:[%s1432_s18 + $0x28] sm:$0xff]   ;;  %v1072_v20 = vld [vmem:[#allocation3 + $0x14] ss:$8 sps:$4 sm:$0xff]   ;;  %v1076_v22 = vld [vmem:[#allocation3 + $0x10] ss:$8 sps:$4 sm:$0xff]   ;;  %s1242_s26 = smov [#allocation8]  }
  0x63   : > { %894 = vmatprep.subr.bf16.mxu0 %v1054_v4  ;;  %956 = vmatprep.subr.bf16.mxu1 %v1054_v4  ;;  %v1066_v18 = vld [vmem:[#allocation3] ss:$8 sps:$4 sm:$0xff]   ;;  %v1074_v21 = vld [vmem:[#allocation3 + $0x54] ss:$8 sps:$4 sm:$0xff]   ;;  %v1077_v23 = vld [vmem:[#allocation3 + $0x50] ss:$8 sps:$4 sm:$0xff]   ;;  %p1150_p4 = pnand %p1149_p11, %p1575_p13 }
  0x64   : > { %549 = vmatprep.mubr.bf16.mxu1 %v1071_v12  ;;  %v1069_v19 = vld [vmem:[#allocation3 + $0x40] ss:$8 sps:$4 sm:$0xff]   ;;  %v1078_v24 = vld [vmem:[#allocation3 + $0x24] ss:$8 sps:$4 sm:$0xff]   ;;  %v1084_v28 = vld [vmem:[#allocation3 + $0x34] ss:$8 sps:$4 sm:$0xff]  }
  0x65   : > { %v1080_v25 = vld [vmem:[#allocation3 + $0x64] ss:$8 sps:$4 sm:$0xff]   ;;  %v1082_v26 = vld [vmem:[#allocation3 + $0x20] ss:$8 sps:$4 sm:$0xff]   ;;  %v1086_v29 = vld [vmem:[#allocation3 + $0x74] ss:$8 sps:$4 sm:$0xff]   ;;  %p1151_p1 = pneg %p1150_p4 }
  0x66   : > { %895 = vmatpush3.bf16.msra.mxu0 %v1055_v5  ;;  %964 = vmatpush3.bf16.msra.mxu1 %v1055_v5  ;;  %v1083_v27 = vld [vmem:[#allocation3 + $0x60] ss:$8 sps:$4 sm:$0xff]   ;;  %v1088_v30 = vld [vmem:[#allocation3 + $0x30] ss:$8 sps:$4 sm:$0xff]   ;;  %s1152_s8 = sshll.u32 %s1242_s26, 4  ;;  %s1153_s8 = int_to_ptr.vmem [resolvable:$false] %s1152_s8 }
  0x67   : > { %896 = vmatprep.subr.bf16.mxu0 %v1056_v6  ;;  %957 = vmatprep.subr.bf16.mxu1 %v1056_v6  ;;  %v1089_v31 = vld [vmem:[#allocation3 + $0x70] ss:$8 sps:$4 sm:$0xff]   ;;  %v1459_v35 = vld [vmem:[%s258_s10] ss:$0 sm:$0xff]  ;;  %s1154_s6 = scalar_lea.vmem %s1153_s8, 4096  ;;  %p1155_p10 = scmp.lt.s32.totalorder %s1498_s28, %s1153_s8 }
  0x68   : > { %p1156_p3 = scmp.lt.s32.totalorder %s1154_s6, %s1148_s7 }
  0x6a   : > { %897 = vmatpush3.bf16.msra.mxu0 %v1057_v7  ;;  %965 = vmatpush3.bf16.msra.mxu1 %v1057_v7  ;;  %p1157_p6 = por %p1156_p3, %p1155_p10 }
  0x6b   : > { %898 = vmatprep.subr.bf16.mxu0 %v1058_v8  ;;  %958 = vmatprep.subr.bf16.mxu1 %v1058_v8 }
  0x6c   : > { %p1158_p0 = pnand %p1157_p6, %p1151_p1 }
  0x6e   : > { %899 = vmatpush3.bf16.msra.mxu0 %v1059_v9  ;;  %966 = vmatpush3.bf16.msra.mxu1 %v1059_v9 }
  0x6f   : > { %900 = vmatprep.subr.bf16.mxu0 %v1060_v10  ;;  %959 = vmatprep.subr.bf16.mxu1 %v1060_v10 }
  0x72   : > { %901 = vmatpush3.bf16.msra.mxu0 %v1061_v13  ;;  %967 = vmatpush3.bf16.msra.mxu1 %v1061_v13 }
  0x73   : > { %902 = vmatprep.subr.bf16.mxu0 %v1062_v14  ;;  %960 = vmatprep.subr.bf16.mxu1 %v1062_v14 }
  0x76   : > { %903 = vmatpush3.bf16.msra.mxu0 %v1063_v15  ;;  %968 = vmatpush3.bf16.msra.mxu1 %v1063_v15 }
  0x77   : > { %904 = vmatprep.subr.bf16.mxu0 %v1064_v16  ;;  %961 = vmatprep.subr.bf16.mxu1 %v1064_v16 }
  0x7a   : > { %905 = vmatpush3.bf16.msra.mxu0 %v1065_v17  ;;  %969 = vmatpush3.bf16.msra.mxu1 %v1065_v17 }
  0x7d   : > { %518 = vmatmul.mubr.bf16.vlgmr.msra.gmra.mrb[0].mxu0 %v1066_v18  ;;  %550 = vmatmul.mubr.bf16.vlgmr.msra.gmra.mrb[0].mxu1 %v1069_v19 }
  0x7e   : > { %525 = vmatprep.mubr.bf16.mxu0 %v1072_v20  ;;  %557 = vmatprep.mubr.bf16.mxu1 %v1074_v21 }
  0x85   : > { %526 = vmatmul.mubr.bf16.gmra.mrb[4].mxu0 %v1076_v22  ;;  %558 = vmatmul.mubr.bf16.gmra.mrb[4].mxu1 %v1077_v23 }
  0x86   : > { %533 = vmatprep.mubr.bf16.mxu0 %v1078_v24  ;;  %565 = vmatprep.mubr.bf16.mxu1 %v1080_v25 }
  0x8d   : > { %534 = vmatmul.mubr.bf16.gmra.mrb[8].mxu0 %v1082_v26  ;;  %566 = vmatmul.mubr.bf16.gmra.mrb[8].mxu1 %v1083_v27 }
  0x8e   : > { %541 = vmatprep.mubr.bf16.mxu0 %v1084_v28  ;;  %573 = vmatprep.mubr.bf16.mxu1 %v1086_v29 }
  0x95   : > { %542 = vmatmul.mubr.bf16.gmra.mrb[12].mxu0 %v1088_v30  ;;  %574 = vmatmul.mubr.bf16.gmra.mrb[12].mxu1 %v1089_v31 }
 0x150   : > { %v906_v32 = vpop.f32.mrb[0].mxu0  ;;  %v930_v33 = vpop.f32.mrb[0].mxu1 }
 0x151   : > { %v907_v34 = vpop.f32.mrb[1].mxu0  ;;  %v931_v36 = vpop.f32.mrb[1].mxu1 }
 0x152   : > { %v908_v37 = vadd.f32 %v907_v34, %v906_v32  ;;  %v932_v38 = vadd.f32 %v931_v36, %v930_v33  ;;  %v909_v39 = vpop.f32.mrb[2].mxu0  ;;  %v933_v40 = vpop.f32.mrb[2].mxu1 }
 0x153   : > { %v910_v41 = vpop.f32.mrb[3].mxu0  ;;  %v934_v42 = vpop.f32.mrb[3].mxu1 }
 0x154   : > { %v680_v43 = vadd.f32 %v908_v37, %v1459_v35  ;;  %v688_v44 = vadd.f32 %v932_v38, %v1459_v35  ;;  %v911_v45 = vadd.f32 %v910_v41, %v909_v39  ;;  %v935_v46 = vadd.f32 %v934_v42, %v933_v40 }
 0x156   : > { %696 = vst [vmem:[%s1465_s11] sm:$0xff] %v680_v43  ;;  %704 = vst [vmem:[%s1465_s11 + $0x40] sm:$0xff] %v688_v44  ;;  %v681_v47 = vadd.f32 %v911_v45, %v1459_v35  ;;  %v689_v48 = vadd.f32 %v935_v46, %v1459_v35 }
 0x158   : > { %697 = vst [vmem:[%s1465_s11 + $0x8] sm:$0xff] %v681_v47  ;;  %705 = vst [vmem:[%s1465_s11 + $0x48] sm:$0xff] %v689_v48  ;;  %v912_v49 = vpop.f32.mrb[4].mxu0  ;;  %v936_v50 = vpop.f32.mrb[4].mxu1 }
 0x159   : > { %v913_v51 = vpop.f32.mrb[5].mxu0  ;;  %v937_v52 = vpop.f32.mrb[5].mxu1 }
 0x15a   : > { %v914_v53 = vadd.f32 %v913_v51, %v912_v49  ;;  %v938_v54 = vadd.f32 %v937_v52, %v936_v50  ;;  %v915_v55 = vpop.f32.mrb[6].mxu0  ;;  %v939_v56 = vpop.f32.mrb[6].mxu1 }
 0x15b   : > { %v916_v57 = vpop.f32.mrb[7].mxu0  ;;  %v940_v58 = vpop.f32.mrb[7].mxu1 }
 0x15c   : > { %v682_v59 = vadd.f32 %v914_v53, %v1459_v35  ;;  %v690_v60 = vadd.f32 %v938_v54, %v1459_v35  ;;  %v917_v61 = vadd.f32 %v916_v57, %v915_v55  ;;  %v941_v62 = vadd.f32 %v940_v58, %v939_v56 }
 0x15e   : > { %698 = vst [vmem:[%s1465_s11 + $0x10] sm:$0xff] %v682_v59  ;;  %706 = vst [vmem:[%s1465_s11 + $0x50] sm:$0xff] %v690_v60  ;;  %v683_v63 = vadd.f32 %v917_v61, %v1459_v35  ;;  %v691_v0 = vadd.f32 %v941_v62, %v1459_v35 }
 0x160   : > { %699 = vst [vmem:[%s1465_s11 + $0x18] sm:$0xff] %v683_v63  ;;  %707 = vst [vmem:[%s1465_s11 + $0x58] sm:$0xff] %v691_v0  ;;  %v918_v1 = vpop.f32.mrb[8].mxu0  ;;  %v942_v2 = vpop.f32.mrb[8].mxu1 }
 0x161   : > { %v919_v3 = vpop.f32.mrb[9].mxu0  ;;  %v943_v4 = vpop.f32.mrb[9].mxu1 }
 0x162   : > { %v920_v5 = vadd.f32 %v919_v3, %v918_v1  ;;  %v944_v6 = vadd.f32 %v943_v4, %v942_v2  ;;  %v921_v7 = vpop.f32.mrb[10].mxu0  ;;  %v945_v8 = vpop.f32.mrb[10].mxu1 }
 0x163   : > { %v922_v9 = vpop.f32.mrb[11].mxu0  ;;  %v946_v10 = vpop.f32.mrb[11].mxu1 }
 0x164   : > { %v684_v11 = vadd.f32 %v920_v5, %v1459_v35  ;;  %v692_v12 = vadd.f32 %v944_v6, %v1459_v35  ;;  %v923_v13 = vadd.f32 %v922_v9, %v921_v7  ;;  %v947_v14 = vadd.f32 %v946_v10, %v945_v8 }
 0x166   : > { %700 = vst [vmem:[%s1465_s11 + $0x20] sm:$0xff] %v684_v11  ;;  %708 = vst [vmem:[%s1465_s11 + $0x60] sm:$0xff] %v692_v12  ;;  %v685_v15 = vadd.f32 %v923_v13, %v1459_v35  ;;  %v693_v16 = vadd.f32 %v947_v14, %v1459_v35 }
 0x168   : > { %701 = vst [vmem:[%s1465_s11 + $0x28] sm:$0xff] %v685_v15  ;;  %709 = vst [vmem:[%s1465_s11 + $0x68] sm:$0xff] %v693_v16  ;;  %v924_v17 = vpop.f32.mrb[12].mxu0  ;;  %v948_v18 = vpop.f32.mrb[12].mxu1 }
 0x169   : > { %v925_v19 = vpop.f32.mrb[13].mxu0  ;;  %v949_v20 = vpop.f32.mrb[13].mxu1 }
 0x16a   : > { %v926_v21 = vadd.f32 %v925_v19, %v924_v17  ;;  %v950_v22 = vadd.f32 %v949_v20, %v948_v18  ;;  %v927_v23 = vpop.f32.mrb[14].mxu0  ;;  %v951_v24 = vpop.f32.mrb[14].mxu1 }
 0x16b   : > { %v928_v25 = vpop.f32.mrb[15].mxu0  ;;  %v952_v26 = vpop.f32.mrb[15].mxu1 }
 0x16c   : > { %v686_v27 = vadd.f32 %v926_v21, %v1459_v35  ;;  %v694_v28 = vadd.f32 %v950_v22, %v1459_v35  ;;  %v929_v29 = vadd.f32 %v928_v25, %v927_v23  ;;  %v953_v30 = vadd.f32 %v952_v26, %v951_v24 }
 0x16e   : > { %702 = vst [vmem:[%s1465_s11 + $0x30] sm:$0xff] %v686_v27  ;;  %710 = vst [vmem:[%s1465_s11 + $0x70] sm:$0xff] %v694_v28  ;;  %v687_v31 = vadd.f32 %v929_v29, %v1459_v35  ;;  %v695_v32 = vadd.f32 %v953_v30, %v1459_v35 }
 0x170   : > { %703 = vst [vmem:[%s1465_s11 + $0x38] sm:$0xff] %v687_v31  ;;  %711 = vst [vmem:[%s1465_s11 + $0x78] sm:$0xff] %v695_v32 }
 0x171   : > { %1161 = shalt.err (!%p1158_p0)
}
 0x172   : > { %s1162_s29 = scalar_lea.hbm %s1496_s15, 2048  ;;  %s1166_s22 = scalar_lea.hbm %s1556_s3, 4096 }
 0x173   : > { %p1163_p2 = scmp.ne.s32.totalorder %s1496_s15, %s1162_s29  ;;  %p1167_p5 = scmp.lt.u32.totalorder %s1496_s15, %s1556_s3 }
 0x174   : > { %p1168_p8 = scmp.lt.u32.totalorder %s1166_s22, %s1162_s29  ;;  %p1170_p11 = scmp.lt.u32.totalorder %s1162_s29, %s1496_s15 }
 0x175   : > { %p1164_p7 = pnand %p1163_p2, %p1575_p13 }
 0x176   : > { %p1169_p9 = por %p1168_p8, %p1167_p5 }
 0x177   : > { %p1165_p12 = pneg %p1164_p7 }
 0x178   : > { %p1171_p4 = por %p1170_p11, %p1169_p9 }
 0x17a   : > { %p1172_p1 = pnand %p1171_p4, %p1165_p12 }
 0x17c   : > { %1175 = shalt.err (!%p1172_p1)
}
 0x17d   : > { %s1243_s11 = smov 128   ;;  %s1244_s21 = smov 256  }
 0x17e   : > { %s1245_s4 = smov 8  }
 0x17f   : > { %976 = dma.vmem_to_hbm [thread:$0]  (%p1575_p13), %s1498_s28, 2048, %s1496_s15, %s713_s27, %s1243_s11, %s1244_s21, %s1245_s4  }
 0x180 PF: > { %s743_s5 = sand.u32 1, %s1214_s12   ;;  %p1576_p10 = scmp.ne.s32.totalorder %s1567_s24, 0 }
 0x181   : > { %p1577_p3 = scmp.ge.s32.totalorder %s1234_s17, 2  ;;  %s744_s7 = scalar_lea.sflag [#allocation5], %s743_s5 }
 0x183   : > { %p987_p6 = pnand %p1577_p3, %p1576_p10 }
 0x185   : > { %1209 = dma.done.wait (!%p987_p6), %s744_s7, 2048  }
 0x186   : > { %1211 = vsyncadd (!%p987_p6), %s744_s7, 4294965248  ;;  %s20_s17 = sadd.s32 1, %s1234_s17   ;;  %s1578_s12 = smov %s1218_s13 }
 0x187   : > { %p17_p0 = scmp.ge.s32.totalorder %s20_s17, 4   ;;  %s1579_s13 = smov %s1222_s14 }
 0x188   : > { %s1580_s14 = smov %s1386_s19  ;;  %s1581_s15 = smov %s1230_s16 }
 0x189   : > { %s1582_s16 = smov %s1584_s30  ;;  %19 = sbr.rel (!%p17_p0) target bundleno = 7 (0x7), region = 98 }
 0x190   :  { %749 = vsyncpa [#allocation4], 1 }
 0x191   :  { %751 = vsyncpa [#allocation4 + $0x1], 1 }
 0x192   :  { %752 = vsyncpa [#allocation7], 1 }
 0x193   :  { %754 = vsyncpa [#allocation7 + $0x1], 1 }
 0x194   :  { %755 = vsyncpa [#allocation5], 1 }
 0x195   :  { %757 = vsyncpa [#allocation5 + $0x1], 1 }

</bundles_post_ra>
